<compile_context>
chip_gen: v7x
topology: tpu7x:2x2x1
jax: 0.10.0
libtpu: 0.0.40
codegen_flags: <defaults>
</compile_context>

<pallas_src>
import functools

import jax
import jax.numpy as jnp
from jax.experimental import pallas as pl
from jax.experimental.pallas import tpu as pltpu

SMOOTH = 1.0


# ------------------------------- kernel --------------------------------------


def _iou_kernel(x_ref, y_ref, iou_ref, sum_xy_ref, sum_s_ref, *,
                true_s, c_tile, strip, n_strips, from_labels, mask_tail):
    # x_ref      : (c_tile, s_tile) prediction tile (any float dtype)
    # y_ref      : (1, s_tile) int32 label strip     (from_labels=True)
    #              (c_tile, s_tile) one-hot tile      (from_labels=False)
    # iou_ref    : (c_tile, 1) f32 per-(b, c) IoU, written on the last spatial step
    # sum_xy_ref : (c_tile, strip) f32 running sum of x*y   (VMEM scratch)
    # sum_s_ref  : (c_tile, strip) f32 running sum of x + y (VMEM scratch)
    sj = pl.program_id(2)
    s_tile = n_strips * strip

    @pl.when(sj == 0)
    def _init():
        sum_xy_ref[...] = jnp.zeros_like(sum_xy_ref)
        sum_s_ref[...] = jnp.zeros_like(sum_s_ref)

    if from_labels:
        # class index of every row of this class tile (hoisted out of the loop)
        cls = (pl.program_id(1) * c_tile
               + jax.lax.broadcasted_iota(jnp.int32, (c_tile, 1), 0))
    if mask_tail:
        lane = jax.lax.broadcasted_iota(jnp.int32, (1, strip), 1)
        base = sj * s_tile

    def accumulate(off):
        xq = x_ref[:, pl.ds(off, strip)].astype(jnp.float32)
        if mask_tail:
            valid = (lane + (base + off)) < true_s            # (1, strip)
            xq = jnp.where(valid, xq, 0.0)                    # kill OOB garbage
        if from_labels:
            hit = y_ref[:, pl.ds(off, strip)] == cls          # (c_tile, strip)
            if mask_tail:
                hit = jnp.logical_and(hit, valid)
            yq = hit.astype(jnp.float32)                      # in-kernel one-hot
        else:
            yq = y_ref[:, pl.ds(off, strip)].astype(jnp.float32)
            if mask_tail:
                yq = jnp.where(valid, yq, 0.0)
        # Accumulate straight into VMEM scratch: no register-carried accumulators.
        sum_xy_ref[...] += xq * yq
        sum_s_ref[...] += xq + yq

    if n_strips == 1:
        accumulate(0)
    else:
        def body(q, carry):
            accumulate(pl.multiple_of(q * strip, strip))
            return carry
        jax.lax.fori_loop(0, n_strips, body, 0, unroll=min(n_strips, 4))

    @pl.when(sj == pl.num_programs(2) - 1)
    def _finalize():
        tp = jnp.sum(sum_xy_ref[...], axis=-1, keepdims=True)   # sum(x*y)
        s = jnp.sum(sum_s_ref[...], axis=-1, keepdims=True)     # sum(x)+sum(y)
        # tp + fp + fn == sum(x) + sum(y) - sum(x*y)
        iou_ref[...] = (tp + SMOOTH) / (s - tp + SMOOTH)


# ------------------------------ tiling ----------------------------------------


def _round_down(a, b):
    return (a // b) * b


def _pick_class_tile(C):
    # Full-extent class block when small (exempt from the 8-sublane rule);
    # otherwise a multiple of 8.  A non-dividing last class tile is fine: its
    # extra output rows are dropped by Pallas, so awkward C never degenerates
    # into tiny tiles.
    return C if C <= 32 else 32


def _pick_spatial_tile(S, c_tile, itemsize):
    # ~4 MiB per x block keeps 2 inputs x 2 pipeline buffers well under the
    # scoped-VMEM limit on every generation (v7x's 64 MiB/TC included).
    cap = max(1024, min(32768, (4 * 1024 * 1024) // (c_tile * itemsize)))
    cap = _round_down(cap, 512)
    if S <= cap:
        return S, 1, False                       # one spatial step, no masking
    if S % 128 == 0:                             # widened exact-divisor search
        m = S // 128
        best = max((d for d in range(1, cap // 128 + 1) if m % d == 0), default=1)
        if best * 128 >= 1024:
            st = best * 128
            return st, S // st, False            # exact tiling, no masking
    return cap, pl.cdiv(S, cap), True            # mask tail in-kernel; no jnp.pad


def _pick_strip(s_tile):
    for w in (512, 256, 128):
        if s_tile % w == 0:
            return w
    return s_tile                                # s_tile == full S, sub-128 case


def _vmem_limit_bytes():
    # Generation-aware scoped-VMEM cap (v7x: 64 MiB/TC vs 128 MiB on v5e/v6e).
    try:
        cap = int(pltpu.get_tpu_info().vmem_capacity_bytes)
    except Exception:
        cap = 128 * 1024 * 1024
    return int(min(cap // 2, 64 * 1024 * 1024))


# ------------------------------ wrapper ----------------------------------------


def iou_loss(x, gt, loss_mask=None, *, c_tile=None, s_tile=None):
    """Forward of IoULoss(apply_nonlin=None, batch_dice=False, do_bg=True,
    smooth=1.0, square=False).

    x  : (B, C, *spatial) predictions (f32 or bf16; cast to f32 in-kernel).
    gt : label map (B, *spatial) / (B, 1, *spatial) of class indices, OR a
         one-hot array of the same shape as x (any float dtype).
    """
    if loss_mask is not None:
        # TODO(synk): loss_mask path of the PyTorch module is not implemented.
        raise NotImplementedError("loss_mask is not supported")

    B, C = x.shape[0], x.shape[1]
    S = 1
    for d in x.shape[2:]:
        S *= d

    x3 = x.reshape(B, C, S)                      # contiguous reshape: no copy

    from_labels = tuple(gt.shape) != tuple(x.shape)
    if from_labels:
        y3 = gt.reshape(B, 1, S).astype(jnp.int32)   # label map stream
    else:
        y3 = gt.reshape(B, C, S)                     # one-hot stream (like x)

    if c_tile is None:
        c_tile = _pick_class_tile(C)
    if s_tile is None:
        s_tile, grid_s, mask_tail = _pick_spatial_tile(S, c_tile, 4)
    else:
        grid_s = pl.cdiv(S, s_tile)
        mask_tail = (S % s_tile) != 0
    strip = _pick_strip(s_tile)
    n_strips = s_tile // strip
    grid_c = pl.cdiv(C, c_tile)
    grid = (B, grid_c, grid_s)

    kernel = functools.partial(
        _iou_kernel, true_s=S, c_tile=c_tile, strip=strip, n_strips=n_strips,
        from_labels=from_labels, mask_tail=mask_tail)

    x_spec = pl.BlockSpec((None, c_tile, s_tile), lambda b, ci, sj: (b, ci, sj))
    if from_labels:
        y_spec = pl.BlockSpec((None, 1, s_tile), lambda b, ci, sj: (b, 0, sj))
    else:
        y_spec = pl.BlockSpec((None, c_tile, s_tile), lambda b, ci, sj: (b, ci, sj))
    out_spec = pl.BlockSpec((None, c_tile, 1), lambda b, ci, sj: (b, ci, 0))

    y_bytes = (grid_c * B * S * 4 if from_labels
               else y3.size * y3.dtype.itemsize)
    cost = pl.CostEstimate(
        flops=4 * B * C * S,                     # mul + adds per element (approx.)
        transcendentals=0,
        bytes_accessed=int(x3.size * x3.dtype.itemsize + y_bytes + B * C * 4))

    iou = pl.pallas_call(
        kernel,
        out_shape=jax.ShapeDtypeStruct((B, C, 1), jnp.float32),
        grid_spec=pltpu.PrefetchScalarGridSpec(
            num_scalar_prefetch=0,
            grid=grid,
            in_specs=[x_spec, y_spec],
            out_specs=out_spec,
            scratch_shapes=[pltpu.VMEM((c_tile, strip), jnp.float32),
                            pltpu.VMEM((c_tile, strip), jnp.float32)],
        ),
        compiler_params=pltpu.CompilerParams(
            # TODO(synk): when B == grid_c == 1 on v7x only one TensorCore is
            # used; a 2-way parallel spatial split with wrapper-side partial-sum
            # combine would light up the second core.
            dimension_semantics=("parallel", "parallel", "arbitrary"),
            vmem_limit_bytes=_vmem_limit_bytes(),
        ),
        cost_estimate=cost,
    )(x3, y3)

    # batch_dice=False, do_bg=True -> mean IoU over all (b, c) entries, negated.
    return -jnp.mean(iou[:, :, 0])


# ----------------------------- reference --------------------------------------


def _reference_iou_loss(x, y_onehot):
    axes = tuple(range(2, x.ndim))
    tp = jnp.sum(x * y_onehot, axis=axes)
    fp = jnp.sum(x * (1.0 - y_onehot), axis=axes)
    fn = jnp.sum((1.0 - x) * y_onehot, axis=axes)
    iou = (tp + SMOOTH) / (tp + fp + fn + SMOOTH)
    return -jnp.mean(iou)


if __name__ == "__main__":
    key = jax.random.PRNGKey(0)
    kx, ky, kx2, ky2 = jax.random.split(key, 4)

    # ---- main test: label-map GT path (one-hot built in-kernel) --------------
    B, C, H, W = 2, 4, 16, 16
    x = jax.random.uniform(kx, (B, C, H, W), dtype=jnp.float32)
    labels = jax.random.randint(ky, (B, H, W), 0, C)

    loss = jax.block_until_ready(iou_loss(x, labels))

    y_onehot = jax.nn.one_hot(labels, C, dtype=jnp.float32).transpose(0, 3, 1, 2)
    ref = _reference_iou_loss(x, y_onehot)
    assert jnp.allclose(loss, ref, atol=1e-5, rtol=1e-5), (loss, ref)

    # ---- one-hot GT path with bf16 one-hot (exact 0/1, half the HBM bytes) ---
    loss_oh = jax.block_until_ready(iou_loss(x, y_onehot.astype(jnp.bfloat16)))
    assert jnp.allclose(loss_oh, ref, atol=1e-5, rtol=1e-5), (loss_oh, ref)

    # ---- multi-tile test: multiple spatial steps, fori_loop strips, in-kernel
    #      tail masking (S % s_tile != 0) and a non-dividing class tile ---------
    B2, C2, H2, W2 = 2, 10, 32, 48               # S = 1536
    x2 = jax.random.uniform(kx2, (B2, C2, H2, W2), dtype=jnp.float32)
    labels2 = jax.random.randint(ky2, (B2, H2, W2), 0, C2)
    loss2 = jax.block_until_ready(iou_loss(x2, labels2, c_tile=8, s_tile=1024))
    y2 = jax.nn.one_hot(labels2, C2, dtype=jnp.float32).transpose(0, 3, 1, 2)
    ref2 = _reference_iou_loss(x2, y2)
    assert jnp.allclose(loss2, ref2, atol=1e-5, rtol=1e-5), (loss2, ref2)

    print("KERNEL_OK")
</pallas_src>

<mosaic_0001>
module attributes {stable_mosaic.version = 11 : i64} {
  func.func @_iou_kernel(%arg0: i32, %arg1: i32, %arg2: i32, %arg3: memref<1x4x256xf32, #tpu.memory_space<vmem>>, %arg4: memref<1x1x256xi32, #tpu.memory_space<vmem>>, %arg5: memref<1x4x1xf32, #tpu.memory_space<vmem>>, %arg6: memref<4x256xf32, #tpu.memory_space<vmem>>, %arg7: memref<4x256xf32, #tpu.memory_space<vmem>>) attributes {dimension_semantics = [#tpu.dimension_semantics<parallel>, #tpu.dimension_semantics<parallel>, #tpu.dimension_semantics<arbitrary>], iteration_bounds = array<i64: 2, 1, 1>, scalar_prefetch = 0 : i64, scratch_operands = 2 : i64, tpu.core_type = #tpu.core_type<tc>, window_params = [{transform_indices = @transform_0, window_bounds = array<i64: 1, 4, 256>}, {transform_indices = @transform_1, window_bounds = array<i64: 1, 1, 256>}, {transform_indices = @transform_2, window_bounds = array<i64: 1, 4, 1>}]} {
    %c0_i32 = arith.constant 0 : i32
    %0 = arith.cmpi eq, %arg2, %c0_i32 : i32
    %1 = arith.extui %0 : i1 to i32
    %c0_i32_0 = arith.constant 0 : i32
    %2 = arith.cmpi ne, %1, %c0_i32_0 : i32
    scf.if %2 {
      %cst = arith.constant 0.000000e+00 : f32
      %27 = vector.broadcast %cst : f32 to vector<4x256xf32>
      %c0_16 = arith.constant 0 : index
      %c0_17 = arith.constant 0 : index
      %28 = vector.load %arg6[%c0_16, %c0_17] : memref<4x256xf32, #tpu.memory_space<vmem>>, vector<4x256xf32>
      tpu.vector_store %arg6[%c0_16, %c0_17], %27 {strides = array<i32>} : memref<4x256xf32, #tpu.memory_space<vmem>>, vector<4x256xf32>,
      %cst_18 = arith.constant 0.000000e+00 : f32
      %29 = vector.broadcast %cst_18 : f32 to vector<4x256xf32>
      %c0_19 = arith.constant 0 : index
      %c0_20 = arith.constant 0 : index
      %30 = vector.load %arg7[%c0_19, %c0_20] : memref<4x256xf32, #tpu.memory_space<vmem>>, vector<4x256xf32>
      tpu.vector_store %arg7[%c0_19, %c0_20], %29 {strides = array<i32>} : memref<4x256xf32, #tpu.memory_space<vmem>>, vector<4x256xf32>,
    } else {
    }
    %c4_i32 = arith.constant 4 : i32
    %3 = arith.muli %arg1, %c4_i32 : i32
    %4 = tpu.iota {dimensions = array<i32: 0>} : vector<4x1xi32>
    %5 = vector.broadcast %3 : i32 to vector<4x1xi32>
    %6 = arith.addi %5, %4 : vector<4x1xi32>
    %c0 = arith.constant 0 : index
    %c0_1 = arith.constant 0 : index
    %c0_2 = arith.constant 0 : index
    %7 = vector.load %arg3[%c0, %c0_1, %c0_2] : memref<1x4x256xf32, #tpu.memory_space<vmem>>, vector<1x4x256xf32>
    %8 = vector.shape_cast %7 : vector<1x4x256xf32> to vector<4x256xf32>
    %c0_3 = arith.constant 0 : index
    %c0_4 = arith.constant 0 : index
    %c0_5 = arith.constant 0 : index
    %9 = vector.load %arg4[%c0_3, %c0_4, %c0_5] : memref<1x1x256xi32, #tpu.memory_space<vmem>>, vector<1x1x256xi32>
    %10 = vector.shape_cast %9 : vector<1x1x256xi32> to vector<1x256xi32>
    %11 = vector.broadcast %10 : vector<1x256xi32> to vector<4x256xi32>
    %12 = vector.broadcast %6 : vector<4x1xi32> to vector<4x256xi32>
    %13 = arith.cmpi eq, %11, %12 : vector<4x256xi32>
    %14 = arith.extui %13 : vector<4x256xi1> to vector<4x256xi32>
    %15 = arith.sitofp %14 : vector<4x256xi32> to vector<4x256xf32>
    %c0_6 = arith.constant 0 : index
    %c0_7 = arith.constant 0 : index
    %16 = vector.load %arg6[%c0_6, %c0_7] : memref<4x256xf32, #tpu.memory_space<vmem>>, vector<4x256xf32>
    %17 = arith.mulf %8, %15 : vector<4x256xf32>
    %18 = arith.addf %16, %17 : vector<4x256xf32>
    %c0_8 = arith.constant 0 : index
    %c0_9 = arith.constant 0 : index
    %19 = vector.load %arg6[%c0_8, %c0_9] : memref<4x256xf32, #tpu.memory_space<vmem>>, vector<4x256xf32>
    tpu.vector_store %arg6[%c0_8, %c0_9], %18 {strides = array<i32>} : memref<4x256xf32, #tpu.memory_space<vmem>>, vector<4x256xf32>,
    %c0_10 = arith.constant 0 : index
    %c0_11 = arith.constant 0 : index
    %20 = vector.load %arg7[%c0_10, %c0_11] : memref<4x256xf32, #tpu.memory_space<vmem>>, vector<4x256xf32>
    %21 = arith.addf %8, %15 : vector<4x256xf32>
    %22 = arith.addf %20, %21 : vector<4x256xf32>
    %c0_12 = arith.constant 0 : index
    %c0_13 = arith.constant 0 : index
    %23 = vector.load %arg7[%c0_12, %c0_13] : memref<4x256xf32, #tpu.memory_space<vmem>>, vector<4x256xf32>
    tpu.vector_store %arg7[%c0_12, %c0_13], %22 {strides = array<i32>} : memref<4x256xf32, #tpu.memory_space<vmem>>, vector<4x256xf32>,
    %c0_i32_14 = arith.constant 0 : i32
    %24 = arith.cmpi eq, %arg2, %c0_i32_14 : i32
    %25 = arith.extui %24 : i1 to i32
    %c0_i32_15 = arith.constant 0 : i32
    %26 = arith.cmpi ne, %25, %c0_i32_15 : i32
    scf.if %26 {
      %c0_16 = arith.constant 0 : index
      %c0_17 = arith.constant 0 : index
      %27 = vector.load %arg6[%c0_16, %c0_17] : memref<4x256xf32, #tpu.memory_space<vmem>>, vector<4x256xf32>
      %cst = arith.constant dense<0.000000e+00> : vector<4xf32>
      %28 = vector.multi_reduction <add>, %27, %cst [1] : vector<4x256xf32> to vector<4xf32>
      %29 = vector.shape_cast %28 : vector<4xf32> to vector<4x1xf32>
      %c0_18 = arith.constant 0 : index
      %c0_19 = arith.constant 0 : index
      %30 = vector.load %arg7[%c0_18, %c0_19] : memref<4x256xf32, #tpu.memory_space<vmem>>, vector<4x256xf32>
      %cst_20 = arith.constant dense<0.000000e+00> : vector<4xf32>
      %31 = vector.multi_reduction <add>, %30, %cst_20 [1] : vector<4x256xf32> to vector<4xf32>
      %32 = vector.shape_cast %31 : vector<4xf32> to vector<4x1xf32>
      %cst_21 = arith.constant 1.000000e+00 : f32
      %33 = vector.broadcast %cst_21 : f32 to vector<4x1xf32>
      %34 = arith.addf %29, %33 : vector<4x1xf32>
      %35 = arith.subf %32, %29 : vector<4x1xf32>
      %cst_22 = arith.constant 1.000000e+00 : f32
      %36 = vector.broadcast %cst_22 : f32 to vector<4x1xf32>
      %37 = arith.addf %35, %36 : vector<4x1xf32>
      %38 = arith.divf %34, %37 : vector<4x1xf32>
      %c0_23 = arith.constant 0 : index
      %c0_24 = arith.constant 0 : index
      %c0_25 = arith.constant 0 : index
      %39 = vector.load %arg5[%c0_23, %c0_24, %c0_25] : memref<1x4x1xf32, #tpu.memory_space<vmem>>, vector<1x4x1xf32>
      %40 = vector.shape_cast %39 : vector<1x4x1xf32> to vector<4x1xf32>
      %41 = vector.shape_cast %38 : vector<4x1xf32> to vector<1x4x1xf32>
      tpu.vector_store %arg5[%c0_23, %c0_24, %c0_25], %41 {strides = array<i32>} : memref<1x4x1xf32, #tpu.memory_space<vmem>>, vector<1x4x1xf32>,
    } else {
    }
    return
  }
  func.func @transform_0(%arg0: i32, %arg1: i32, %arg2: i32) -> (i32, i32, i32) {
    %c0_i32 = arith.constant 0 : i32
    return %arg0, %arg1, %arg2 : i32, i32, i32
  }
  func.func @transform_1(%arg0: i32, %arg1: i32, %arg2: i32) -> (i32, i32, i32) {
    %c0_i32 = arith.constant 0 : i32
    %c0_i32_0 = arith.constant 0 : i32
    return %arg0, %c0_i32, %arg2 : i32, i32, i32
  }
  func.func @transform_2(%arg0: i32, %arg1: i32, %arg2: i32) -> (i32, i32, i32) {
    %c0_i32 = arith.constant 0 : i32
    %c0_i32_0 = arith.constant 0 : i32
    return %arg0, %arg1, %c0_i32 : i32, i32, i32
  }
}

</mosaic_0001>

<bundles_post_ra>
// kernel: tpu_custom_call.1
= control target key start
LH: loop header
LB: loop body
LE: loop exit
PB: predicated region body
PF: predicated region fallthrough
CT: control target
= control target key end

     0   :  { %7 = vsyncpa [#allocation5], 0  ;;  %s904_s0 = inlined_call_operand.hbm [shape: f32[2,4,256], index: 0, kind: input, shape index: {}]   ;;  %s905_s1 = inlined_call_operand.hbm [shape: s32[2,1,256], index: 1, kind: input, shape index: {}]   ;;  %s906_s2 = inlined_call_operand.hbm [shape: f32[2,4,1], index: 2, kind: output, shape index: {}]  }
   0x1   :  { %9 = vsyncpa [#allocation5 + $0x1], 0 }
   0x2   :  { %10 = vsyncpa [#allocation8], 0 }
   0x3   :  { %12 = vsyncpa [#allocation8 + $0x1], 0 }
   0x4   :  { %13 = vsyncpa [#allocation6], 0 }
   0x5   :  { %15 = vsyncpa [#allocation6 + $0x1], 0  ;;  %s688_s9 = smov 0   ;;  %s690_s10 = smov 0  }
   0x6   :  { %s692_s11 = smov 0   ;;  %s694_s12 = smov 0  }
   0x7   :  { %s696_s13 = smov 0   ;;  %s698_s14 = smov 0  }
   0x8 LB: > { %s429_s15 = sadd.s32 4294967295, %s667_s14   ;;  %s430_s16 = sadd.s32 4294967294, %s667_s14   ;;  %s667_s14 = sphi %s698_s14, %s21_s14   ;;  %s663_s13 = sphi %s696_s13, %s926_s13   ;;  %s659_s12 = sphi %s694_s12, %s925_s12   ;;  %s655_s11 = sphi %s692_s11, %s924_s11   ;;  %s651_s10 = sphi %s690_s10, %s923_s10   ;;  %s647_s9 = sphi %s688_s9, %s922_s9  }
   0x9   : > { %s40_s17 = sadd.s32 1, %s663_s13  ;;  %s51_s18 = sadd.s32 1, %s655_s11 }
   0xa   : > { %p42_p0 = scmp.ge.s32.totalorder %s40_s17, 2  ;;  %p58_p1 = scmp.ne.s32.totalorder %s655_s11, %s651_s10 }
   0xb   : > { %p59_p2 = scmp.eq.s32.totalorder %s667_s14, 0  ;;  %p64_p3 = scmp.ne.s32.totalorder %s651_s10, %s647_s9 }
   0xc   : > { %s928_s17 = smov (%p42_p0, %s40_s17), 0  ;;  %p65_p5 = scmp.eq.s32.totalorder %s429_s15, 0 }
   0xd   : > { %p729_p4 = por %p59_p2, %p58_p1  ;;  %s44_s20 = ssub.s32 %s663_s13, %s928_s17 }
   0xe   : > { %p118_p6 = scmp.eq.s32.totalorder %s429_s15, 1  ;;  %p49_p7 = scmp.eq.s32.totalorder %s44_s20, 0 }
   0xf   : > { %p735_p8 = por %p65_p5, %p64_p3  ;;  %p124_p10 = scmp.eq.s32.totalorder %s430_s16, 1 }
  0x10   : > { %p739_p9 = por %p118_p6, %p58_p1  ;;  %p468_p13 = scmp.lt.s32.totalorder %s667_s14, 2 }
  0x11   : > { %s910_s21 = scalar_select %p735_p8, 1, 0 }
  0x12   : > { %s911_s22 = scalar_select %p739_p9, 1, 0 }
  0x13   : > { %s744_s23 = scalar_select %p49_p7, %s655_s11, %s51_s18  }
  0x14   : > { %p746_p11 = por %p124_p10, %p64_p3  ;;  %s753_s25 = sand.u32 1, %s655_s11  }
  0x15   : > { %s433_s26 = sshll.u32 %s753_s25, 3  ;;  %s449_s27 = sshll.u32 %s663_s13, 7 }
  0x16   : > { %s912_s24 = scalar_select %p746_p11, 1, 0 }
  0x17   : > { %s760_s30 = scalar_lea.hbm %s904_s0, %s449_s27  ;;  %s148_s3 = scalar_lea.vmem [#allocation4], %s433_s26 }
  0x18   : > { %s160_s4 = sshll.u32 %s148_s3, 4  ;;  %p766_p0 = pnand %p468_p13, %p729_p4  ;;  %s762_s4 = int_to_ptr.vmem [resolvable:$true] %s160_s4 }
  0x19   : > { %s145_s6 = scalar_lea.sflag [#allocation5], %s753_s25  ;;  %s521_s7 = scalar_lea.hbm %s760_s30, 128 }
  0x1a   : > { %p522_p3 = scmp.ne.s32.totalorder %s760_s30, %s521_s7  ;;  %p523_p5 = pneg %p766_p0 }
  0x1b   : > { %s526_s16 = scalar_lea.hbm %s904_s0, 256  ;;  %p527_p4 = scmp.lt.u32.totalorder %s760_s30, %s904_s0 }
  0x1c   : > { %p524_p6 = pnand %p523_p5, %p522_p3  ;;  %p528_p10 = scmp.lt.u32.totalorder %s526_s16, %s521_s7 }
  0x1d   : > { %p530_p12 = scmp.lt.u32.totalorder %s521_s7, %s760_s30 }
  0x1e   : > { %p525_p7 = pneg %p524_p6  ;;  %p529_p13 = por %p528_p10, %p527_p4 }
  0x20   : > { %p531_p1 = por %p530_p12, %p529_p13 }
  0x22   : > { %p532_p2 = pnand %p531_p1, %p525_p7 }
  0x24   : > { %535 = shalt.err (!%p532_p2)
}
  0x25   : > { %s536_s20 = scalar_lea.vmem %s762_s4, 128  ;;  %s669_s26 = smov [#allocation4]  }
  0x26   : > { %p537_p3 = scmp.ne.s32.totalorder %s762_s4, %s536_s20  ;;  %s541_s27 = sshll.u32 %s669_s26, 4  ;;  %s542_s27 = int_to_ptr.vmem [resolvable:$false] %s541_s27 }
  0x27   : > { %s543_s28 = scalar_lea.vmem %s542_s27, 256  ;;  %p544_p9 = scmp.lt.s32.totalorder %s762_s4, %s542_s27 }
  0x28   : > { %p539_p6 = pnand %p537_p3, %p523_p5  ;;  %p545_p4 = scmp.lt.s32.totalorder %s543_s28, %s536_s20 }
  0x2a   : > { %p540_p11 = pneg %p539_p6  ;;  %p546_p10 = por %p545_p4, %p544_p9 }
  0x2c   : > { %p547_p12 = pnand %p546_p10, %p540_p11 }
  0x2e   : > { %550 = shalt.err (!%p547_p12)
}
  0x2f   : > { %460 = dma.hbm_to_vmem [thread:$0]  (!%p766_p0), %s760_s30, 128, %s762_s4, %s145_s6  }
  0x30   : > { %p914_p1 = scmp.lt.s32.totalorder %s667_s14, 3  ;;  %p915_p2 = scmp.ge.s32.totalorder %s667_s14, 1 }
  0x31   : > { %s436_s3 = sshll.u32 %s753_s25, 1  ;;  %s450_s7 = sshll.u32 %s663_s13, 5 }
  0x32   : > { %p802_p7 = pnand %p915_p2, %p914_p1  ;;  %s811_s16 = scalar_lea.hbm %s905_s1, %s450_s7 }
  0x33   : > { %s171_s18 = scalar_lea.vmem [#allocation7], %s436_s3  ;;  %s168_s30 = scalar_lea.sflag [#allocation8], %s753_s25 }
  0x34   : > { %s916_s29 = scalar_select %p802_p7, 1, 0 }
  0x35   : > { %s181_s19 = sshll.u32 %s171_s18, 4  ;;  %s551_s4 = scalar_lea.hbm %s811_s16, 32  ;;  %s182_s19 = int_to_ptr.vmem [resolvable:$true] %s181_s19 }
  0x36   : > { %p552_p9 = scmp.ne.s32.totalorder %s811_s16, %s551_s4  ;;  %s556_s26 = scalar_lea.hbm %s905_s1, 64 }
  0x37   : > { %p557_p3 = scmp.lt.u32.totalorder %s811_s16, %s905_s1  ;;  %p558_p6 = scmp.lt.u32.totalorder %s556_s26, %s551_s4 }
  0x38   : > { %p554_p11 = pnand %p552_p9, %p523_p5  ;;  %p560_p10 = scmp.lt.u32.totalorder %s551_s4, %s811_s16 }
  0x39   : > { %p559_p4 = por %p558_p6, %p557_p3 }
  0x3a   : > { %p555_p13 = pneg %p554_p11 }
  0x3b   : > { %p561_p12 = por %p560_p10, %p559_p4 }
  0x3d   : > { %p562_p1 = pnand %p561_p12, %p555_p13 }
  0x3f   : > { %565 = shalt.err (!%p562_p1)
}
  0x40   : > { %s566_s25 = scalar_lea.vmem %s182_s19, 32  ;;  %s670_s3 = smov [#allocation7]  }
  0x41   : > { %p567_p2 = scmp.ne.s32.totalorder %s182_s19, %s566_s25  ;;  %s571_s7 = sshll.u32 %s670_s3, 4  ;;  %s572_s7 = int_to_ptr.vmem [resolvable:$false] %s571_s7 }
  0x42   : > { %s573_s8 = scalar_lea.vmem %s572_s7, 64  ;;  %p574_p8 = scmp.lt.s32.totalorder %s182_s19, %s572_s7 }
  0x43   : > { %p569_p9 = pnand %p567_p2, %p523_p5  ;;  %p575_p7 = scmp.lt.s32.totalorder %s573_s8, %s566_s25 }
  0x45   : > { %p570_p11 = pneg %p569_p9  ;;  %p576_p3 = por %p575_p7, %p574_p8 }
  0x47   : > { %p577_p6 = pnand %p576_p3, %p570_p11 }
  0x49   : > { %580 = shalt.err (!%p577_p6)
}
  0x4a   : > { %463 = dma.hbm_to_vmem [thread:$0]  (!%p766_p0), %s811_s16, 32, %s182_s19, %s168_s30  }
  0x4b   : > { %p917_p13 = scmp.ne.s32.totalorder %s916_s29, 0 }
  0x4c   : > { %s836_s15 = sand.u32 (!%p917_p13), 1, %s651_s10   ;;  %p918_p5 = scmp.ne.s32.totalorder (!%p917_p13), %s910_s21, 0 }
  0x4d   : > { %190 = sbr.rel (%p917_p13) target bundleno = 284 (0x11c), region = 28  ;;  %s440_s18 = sshll.u32 (!%p917_p13), %s836_s15, 3 }
  0x4e   : > { %s193_s4 = scalar_lea.sflag (!%p917_p13), [#allocation5], %s836_s15  ;;  %s196_s6 = scalar_lea.vmem (!%p917_p13), [#allocation4], %s440_s18 }
  0x54   : > { %634 = dma.done.wait (%p918_p5), %s193_s4, 128  }
  0x55   : > { %636 = vsyncadd (%p918_p5), %s193_s4, 4294967168  ;;  %s441_s5 = sshll.u32 %s836_s15, 1  ;;  %s202_s29 = scalar_lea.sflag [#allocation8], %s836_s15 }
  0x56   : > { %s205_s16 = scalar_lea.vmem [#allocation7], %s441_s5 }
  0x57   : > { %638 = dma.done.wait (%p918_p5), %s202_s29, 32  }
  0x58   : > { %640 = vsyncadd (%p918_p5), %s202_s29, 4294967264  ;;  %v240_v0 = vlaneseq  ;;  %v245_v4 = vld [vmem:[%s205_s16] sm:$0x3]  ;;  %v244_v7 = vld [vmem:[%s196_s6] sm:$0xff]  ;;  %v671_v8 = vmov 0.0   ;;  %vm279_vm2 = vcmask 1043456  }
  0x59   : > { %s442_s21 = sshll.u32 %s836_s15, 2  ;;  %s446_s19 = sshll.u32 %s659_s12, 6  ;;  %vm299_vm3 = vcmask 3072  }
  0x5a   : > { %v241_v1 = vshrl.u32 %v240_v0, 7  ;;  %s230_s30 = scalar_lea.vmem [#allocation9], %s442_s21  ;;  %s855_s28 = scalar_lea.hbm %s906_s2, %s446_s19 }
  0x5b   : > { %s316_s20 = sshll.u32 %s230_s30, 4  ;;  %s302_s25 = scalar_lea.sflag [#allocation6], %s836_s15  ;;  %s857_s20 = int_to_ptr.vmem [resolvable:$true] %s316_s20 }
  0x5c   : > { %v248_v2 = vsub.s32 0, %v241_v1  ;;  %v252_v3 = vsub.s32 1, %v241_v1  ;;  %s581_s3 = scalar_lea.vmem %s857_s20, 64  ;;  %p919_p0 = scmp.ne.s32.totalorder %s911_s22, 0 }
  0x5d   : > { %p582_p8 = scmp.ne.s32.totalorder %s857_s20, %s581_s3  ;;  %s672_s12 = smov [#allocation9]  }
  0x5e   : > { %v249_v5 = vrot.slane %v245_v4, %v248_v2  ;;  %v253_v6 = vrot.slane %v245_v4, %v252_v3  ;;  %s585_s7 = sshll.u32 %s672_s12, 4  ;;  %s586_s7 = int_to_ptr.vmem [resolvable:$false] %s585_s7 }
  0x5f   : > { %p583_p7 = pnand %p582_p8, %p919_p0  ;;  %s587_s8 = scalar_lea.vmem %s586_s7, 128 }
  0x60   : > { %vm254_vm0 = vcmp.eq.s32.totalorder %v249_v5, %v241_v1  ;;  %vm255_vm1 = vcmp.eq.s32.totalorder %v253_v6, %v241_v1  ;;  %p588_p10 = scmp.lt.s32.totalorder %s857_s20, %s586_s7  ;;  %p589_p12 = scmp.lt.s32.totalorder %s587_s8, %s581_s3 }
  0x61   : > { %v443_v9 = vsel %vm254_vm0, 1.0, %v671_v8  ;;  %v444_v10 = vsel %vm255_vm1, 1.0, %v671_v8  ;;  %p584_p4 = pneg %p583_p7 }
  0x62   : > { %v263_v11 = vcombine.low %v443_v9, %v444_v10  ;;  %p590_p1 = por %p589_p12, %p588_p10 }
  0x64   : > { %v265_v12 = vmul.f32 %v263_v11, %v244_v7  ;;  %v269_v13 = vadd.f32 %v263_v11, %v244_v7  ;;  %p591_p2 = pnand %p590_p1, %p584_p4 }
  0x66   : > { %v277_v14 = vcombine.high %v265_v12, %v265_v12  ;;  %v280_v15 = vsel %vm279_vm2, %v265_v12, 0.0  ;;  %v287_v16 = vcombine.high %v269_v13, %v269_v13  ;;  %v289_v18 = vsel %vm279_vm2, %v269_v13, 0.0 }
  0x68   : > { %v281_v17 = vsel %vm279_vm2, %v277_v14, 0.0  ;;  %v290_v19 = vsel %vm279_vm2, %v287_v16, 0.0 }
  0x69   : > { %v282_v20 = vadd.f32 %v281_v17, %v280_v15  ;;  %v291_v21 = vadd.f32 %v290_v19, %v289_v18 }
  0x6b   : > { %283 = vadd.xlane.f32.xlu0 %v282_v20 }
  0x6f   : > { %292 = vadd.xlane.f32.xlu0 %v291_v21 }
  0xf8   : > { %v284_v22 = vpop.xlane.xlu0 %283 }
  0xf9   : > { %v294_v26 = vadd.f32 1.0, %v284_v22 }
  0xfc   : > { %v293_v23 = vpop.xlane.xlu0 %292 }
  0xfd   : > { %v295_v24 = vsub.f32 %v293_v23, %v284_v22 }
  0xff   : > { %v296_v25 = vadd.f32 1.0, %v295_v24 }
 0x101   : > { %519 = vrcp.f32 %v296_v25 }
 0x10b   : > { %v520_v27 = vpop.eup %519 }
 0x10c   : > { %v298_v28 = vmul.f32 %v520_v27, %v294_v26 }
 0x10e   : > { %300 = vst.msk [vmem:[%s230_s30] sm:$0xf] %vm299_vm3, %v298_v28 }
 0x10f   : > { %594 = shalt.err (!%p591_p2)
}
 0x110   : > { %s595_s15 = scalar_lea.hbm %s855_s28, 64  ;;  %s599_s6 = scalar_lea.hbm %s906_s2, 128 }
 0x111   : > { %p596_p9 = scmp.ne.s32.totalorder %s855_s28, %s595_s15  ;;  %p600_p6 = scmp.lt.u32.totalorder %s855_s28, %s906_s2 }
 0x112   : > { %p601_p13 = scmp.lt.u32.totalorder %s599_s6, %s595_s15  ;;  %p603_p8 = scmp.lt.u32.totalorder %s595_s15, %s855_s28 }
 0x113   : > { %p597_p11 = pnand %p596_p9, %p919_p0 }
 0x114   : > { %p602_p5 = por %p601_p13, %p600_p6 }
 0x115   : > { %p598_p3 = pneg %p597_p11 }
 0x116   : > { %p604_p7 = por %p603_p8, %p602_p5 }
 0x118   : > { %p605_p4 = pnand %p604_p7, %p598_p3 }
 0x11a   : > { %608 = shalt.err (!%p605_p4)
}
 0x11b   : > { %455 = dma.vmem_to_hbm [thread:$0]  (%p919_p0), %s857_s20, 64, %s855_s28, %s302_s25  }
 0x11c PF: > { %s328_s16 = sand.u32 1, %s647_s9   ;;  %p920_p10 = scmp.ne.s32.totalorder %s912_s24, 0 }
 0x11d   : > { %p921_p12 = scmp.ge.s32.totalorder %s667_s14, 2  ;;  %s329_s21 = scalar_lea.sflag [#allocation6], %s328_s16 }
 0x11f   : > { %p465_p1 = pnand %p921_p12, %p920_p10 }
 0x121   : > { %642 = dma.done.wait (!%p465_p1), %s329_s21, 64  }
 0x122   : > { %644 = vsyncadd (!%p465_p1), %s329_s21, 4294967232  ;;  %s21_s14 = sadd.s32 1, %s667_s14   ;;  %s922_s9 = smov %s651_s10 }
 0x123   : > { %p18_p2 = scmp.ge.s32.totalorder %s21_s14, 4   ;;  %s923_s10 = smov %s655_s11 }
 0x124   : > { %s924_s11 = smov %s744_s23  ;;  %s925_s12 = smov %s663_s13 }
 0x125   : > { %s926_s13 = smov %s928_s17  ;;  %20 = sbr.rel (!%p18_p2) target bundleno = 8 (0x8), region = 94 }
 0x12c   :  { %334 = vsyncpa [#allocation5], 1 }
 0x12d   :  { %336 = vsyncpa [#allocation5 + $0x1], 1 }
 0x12e   :  { %337 = vsyncpa [#allocation8], 1 }
 0x12f   :  { %339 = vsyncpa [#allocation8 + $0x1], 1 }
 0x130   :  { %340 = vsyncpa [#allocation6], 1 }
 0x131   :  { %342 = vsyncpa [#allocation6 + $0x1], 1 }

</bundles_post_ra>
